<compile_context>
chip_gen: v7x
topology: tpu7x:2x2x1
jax: 0.10.0
libtpu: 0.0.40
codegen_flags: <defaults>
</compile_context>

<pallas_src>
import functools

import jax
import jax.numpy as jnp
from jax import lax
from jax.experimental import pallas as pl
from jax.experimental.pallas import tpu as pltpu


def spatial_gcn_kernel(x_ref, wkvq_ref, bkvq_ref, wout_ref, bout_ref, out_ref,
                       *, c_valid, n_valid):
    block_b, plane, n_pad = x_ref.shape
    three_cp = wkvq_ref.shape[0]
    cp = three_cp // 3

    x = x_ref[...]                                          # (bb, plane, Np)

    # Broadcast the tiny resident weights across the batch block once; the
    # batched matmuls below then use the canonical batch-leading pattern.
    wkvq = jnp.broadcast_to(wkvq_ref[...][None], (block_b, three_cp, plane))
    wout = jnp.broadcast_to(wout_ref[...][None], (block_b, plane, cp))
    bkvq = bkvq_ref[...][None]                              # (1, 3cp, 1)
    bout = bout_ref[...][None]                              # (1, plane, 1)

    # Fused node_k / node_v / node_q 1x1 convs: one batched MXU matmul over
    # the whole (block_b, plane, Np) block.
    kvq = jnp.einsum('bkp,bpn->bkn', wkvq, x,
                     preferred_element_type=jnp.float32) + bkvq   # (bb, 3cp, Np)

    # Sublane-aligned views (cp is a multiple of 8 for f32).
    k = kvq[:, 0 * cp:1 * cp]                               # (bb, cp, Np)
    v = kvq[:, 1 * cp:2 * cp]
    q = kvq[:, 2 * cp:3 * cp]

    if n_valid != n_pad:
        # Zero padded spatial columns of V so they do not contribute to Q@V^T
        # (padded K columns only produce padded output columns, sliced away).
        lane = lax.broadcasted_iota(jnp.int32, v.shape, 2)
        v = jnp.where(lane < n_valid, v, 0.0)

    # Batched attention: S = Q @ V^T per sample, row softmax, M = A^T @ K.
    s = jnp.einsum('bcn,bdn->bcd', q, v,
                   preferred_element_type=jnp.float32)       # (bb, cp, cp)
    if c_valid != cp:
        # Padded attention columns must not leak into the softmax denominator.
        col = lax.broadcasted_iota(jnp.int32, s.shape, 2)
        s = jnp.where(col < c_valid, s, jnp.float32(-1e30))
    s = s - jnp.max(s, axis=-1, keepdims=True)
    e = jnp.exp(s)
    a = e / jnp.sum(e, axis=-1, keepdims=True)               # (bb, cp, cp)

    # bmm(node_k^T, A) then transpose(1,2) == A^T @ K, expressed directly as a
    # dot_general contracting A's row dim (no materialized transpose).
    m = jnp.einsum('bcd,bcn->bdn', a, k,
                   preferred_element_type=jnp.float32)       # (bb, cp, Np)

    # conv_wg + bn_wg + out conv + out BN folded into one batched matmul,
    # then residual + ReLU.
    o = jnp.einsum('bpc,bcn->bpn', wout, m,
                   preferred_element_type=jnp.float32) + bout
    out_ref[...] = jnp.maximum(o + x, 0.0)


def fold_params(params, cp):
    """Stack K/V/Q weights (rows padded to cp) and fold conv_wg + bn_wg +
    out-conv + out-BN (eval-mode BN) into one (plane, cp) weight + bias."""
    (wk, bk, wv, bv, wq, bq, wg, bnwg_s, bnwg_b, wo, bo, bnout_s, bnout_b) = params
    c = wk.shape[0]

    def pad_rows(a):
        return jnp.pad(a, ((0, cp - c), (0, 0)))

    wkvq = jnp.concatenate([pad_rows(wk), pad_rows(wv), pad_rows(wq)], axis=0)
    bkvq = jnp.concatenate([pad_rows(bk), pad_rows(bv), pad_rows(bq)], axis=0)
    w_out = bnout_s * (wo @ (bnwg_s * wg))                   # (plane, c)
    b_out = bnout_s * (wo @ bnwg_b + bo) + bnout_b           # (plane, 1)
    w_out = jnp.pad(w_out, ((0, 0), (0, cp - c)))            # (plane, cp)
    return wkvq, bkvq, w_out, b_out


def _round_up(v, m):
    return (v + m - 1) // m * m


def _vmem_block_bytes(block_b, plane, cp, n_pad):
    """Rough f32 VMEM footprint of one grid step: double-buffered in/out
    blocks + the kvq / m / o intermediates + resident (double-buffered)
    weights."""
    io = 2 * 2 * block_b * plane * n_pad * 4
    inter = block_b * (3 * cp + cp + plane) * n_pad * 4
    weights = (3 * cp * plane + 3 * cp + plane * cp + plane) * 4 * 2
    return io + inter + weights


def _pick_block_b(b, plane, cp, n_pad, *, min_grid_steps, vmem_budget_bytes):
    """Largest divisor of b that fits the VMEM budget and keeps the pipeline
    at least `min_grid_steps` deep (raise to 4 on v7x to feed both cores)."""
    steps_needed = min(min_grid_steps, b)
    best = 1
    for cand in range(b, 0, -1):
        if b % cand:
            continue
        if b // cand < steps_needed:
            continue
        if _vmem_block_bytes(cand, plane, cp, n_pad) > vmem_budget_bytes:
            continue
        best = cand
        break
    return best


def spatial_gcn_pallas(x, params, *, block_b=None, min_grid_steps=2,
                       vmem_budget_bytes=24 * 1024 * 1024):
    b, plane, h, w = x.shape
    c = plane // 2
    cp = _round_up(max(c, 1), 8)       # sublane-aligned inter_plane (f32; 16 for bf16)
    n = h * w
    n_pad = _round_up(n, 128)          # lane-dense spatial axis

    x_flat = x.reshape(b, plane, n)    # free reshape, N on the lane axis
    if n_pad != n:
        x_flat = jnp.pad(x_flat, ((0, 0), (0, 0), (0, n_pad - n)))

    wkvq, bkvq, w_out, b_out = fold_params(params, cp)

    if block_b is None:
        block_b = _pick_block_b(b, plane, cp, n_pad,
                                min_grid_steps=min_grid_steps,
                                vmem_budget_bytes=vmem_budget_bytes)
    assert b % block_b == 0, "block_b must divide the batch size"

    est = _vmem_block_bytes(block_b, plane, cp, n_pad)
    vmem_limit = int(min(max(4 * est, 16 * 1024 * 1024), 64 * 1024 * 1024))

    kernel = functools.partial(spatial_gcn_kernel, c_valid=c, n_valid=n)

    def wspec(shape):
        return pl.BlockSpec(shape, lambda i: (0, 0))   # constant block -> fetched once

    out_flat = pl.pallas_call(
        kernel,
        out_shape=jax.ShapeDtypeStruct((b, plane, n_pad), jnp.float32),
        grid=(b // block_b,),
        in_specs=[
            pl.BlockSpec((block_b, plane, n_pad), lambda i: (i, 0, 0)),
            wspec((3 * cp, plane)),            # stacked (padded) K/V/Q weight
            wspec((3 * cp, 1)),                # stacked (padded) K/V/Q bias
            wspec((plane, cp)),                # folded wg/bn_wg/out/bn_out weight
            wspec((plane, 1)),                 # folded bias
        ],
        out_specs=pl.BlockSpec((block_b, plane, n_pad), lambda i: (i, 0, 0)),
        compiler_params=pltpu.CompilerParams(
            dimension_semantics=("parallel",),
            vmem_limit_bytes=vmem_limit),
    )(x_flat, wkvq, bkvq, w_out, b_out)

    return out_flat[:, :, :n].reshape(b, plane, h, w)


def fold_bn(gamma, beta, mean, var, eps=1e-5):
    scale = gamma / jnp.sqrt(var + eps)
    shift = beta - mean * scale
    return scale[:, None], shift[:, None]


def make_params(key, plane):
    c = plane // 2
    ks = jax.random.split(key, 17)
    s = 0.2
    wk = s * jax.random.normal(ks[0], (c, plane), jnp.float32)
    bk = s * jax.random.normal(ks[1], (c,), jnp.float32)
    wv = s * jax.random.normal(ks[2], (c, plane), jnp.float32)
    bv = s * jax.random.normal(ks[3], (c,), jnp.float32)
    wq = s * jax.random.normal(ks[4], (c, plane), jnp.float32)
    bq = s * jax.random.normal(ks[5], (c,), jnp.float32)
    wg = s * jax.random.normal(ks[6], (c, c), jnp.float32)
    # bn_wg (inference-mode running stats)
    g1 = 1.0 + 0.1 * jax.random.normal(ks[7], (c,), jnp.float32)
    b1 = 0.1 * jax.random.normal(ks[8], (c,), jnp.float32)
    m1 = 0.1 * jax.random.normal(ks[9], (c,), jnp.float32)
    v1 = 0.5 + jnp.abs(jax.random.normal(ks[10], (c,), jnp.float32))
    wo = s * jax.random.normal(ks[11], (plane, c), jnp.float32)
    bo = s * jax.random.normal(ks[12], (plane,), jnp.float32)
    # out BN2d (inference-mode running stats)
    g2 = 1.0 + 0.1 * jax.random.normal(ks[13], (plane,), jnp.float32)
    b2 = 0.1 * jax.random.normal(ks[14], (plane,), jnp.float32)
    m2 = 0.1 * jax.random.normal(ks[15], (plane,), jnp.float32)
    v2 = 0.5 + jnp.abs(jax.random.normal(ks[16], (plane,), jnp.float32)) ** 2

    bnwg_s, bnwg_b = fold_bn(g1, b1, m1, v1)
    bnout_s, bnout_b = fold_bn(g2, b2, m2, v2)

    return (wk, bk[:, None], wv, bv[:, None], wq, bq[:, None],
            wg, bnwg_s, bnwg_b,
            wo, bo[:, None], bnout_s, bnout_b)


def spatial_gcn_reference(x, params):
    """Pure-JAX mirror of the PyTorch forward (eval-mode BN), unfused params."""
    (wk, bk, wv, bv, wq, bq, wg, bnwg_s, bnwg_b, wo, bo, bnout_s, bnout_b) = params
    b, plane, h, w = x.shape
    n = h * w
    xf = x.reshape(b, plane, n)
    K = jnp.einsum("op,bpn->bon", wk, xf) + bk          # (b, c, N)
    V = jnp.einsum("op,bpn->bon", wv, xf) + bv
    Q = jnp.einsum("op,bpn->bon", wq, xf) + bq
    A = jnp.einsum("bcn,bdn->bcd", Q, V)                # (b, c, c)
    A = jax.nn.softmax(A, axis=2)
    M = jnp.einsum("bcd,bcn->bdn", A, K)                # == A^T @ K  (b, c, N)
    AVW = jnp.einsum("od,bdn->bon", wg, M)
    AVW = AVW * bnwg_s + bnwg_b
    O = jnp.einsum("oc,bcn->bon", wo, AVW) + bo
    O = O * bnout_s + bnout_b
    return jnp.maximum(O + xf, 0.0).reshape(b, plane, h, w)


if __name__ == "__main__":
    plane, batch, h, w = 16, 4, 16, 8      # inter_plane = 8, N = 128 (lane-dense)
    key = jax.random.PRNGKey(0)
    kx, kp = jax.random.split(key)
    x = jax.random.normal(kx, (batch, plane, h, w), jnp.float32)
    params = make_params(kp, plane)

    out = jax.block_until_ready(spatial_gcn_pallas(x, params))

    ref = spatial_gcn_reference(x, params)
    assert out.shape == (batch, plane, h, w)
    err = float(jnp.max(jnp.abs(out - ref)))
    assert err < 1e-4, f"mismatch vs reference: {err}"
    print("KERNEL_OK")
</pallas_src>

<mosaic_0001>
module attributes {stable_mosaic.version = 11 : i64} {
  func.func @spatial_gcn_kernel(%arg0: i32, %arg1: memref<2x16x128xf32, #tpu.memory_space<vmem>>, %arg2: memref<24x16xf32, #tpu.memory_space<vmem>>, %arg3: memref<24x1xf32, #tpu.memory_space<vmem>>, %arg4: memref<16x8xf32, #tpu.memory_space<vmem>>, %arg5: memref<16x1xf32, #tpu.memory_space<vmem>>, %arg6: memref<2x16x128xf32, #tpu.memory_space<vmem>>) attributes {dimension_semantics = [#tpu.dimension_semantics<parallel>], iteration_bounds = array<i64: 2>, scalar_prefetch = 0 : i64, scratch_operands = 0 : i64, tpu.core_type = #tpu.core_type<tc>, window_params = [{transform_indices = @transform_0, window_bounds = array<i64: 2, 16, 128>}, {pipeline_mode = #tpu.pipeline_mode<synchronous>, transform_indices = @transform_1, window_bounds = array<i64: 24, 16>}, {pipeline_mode = #tpu.pipeline_mode<synchronous>, transform_indices = @transform_2, window_bounds = array<i64: 24, 1>}, {pipeline_mode = #tpu.pipeline_mode<synchronous>, transform_indices = @transform_3, window_bounds = array<i64: 16, 8>}, {pipeline_mode = #tpu.pipeline_mode<synchronous>, transform_indices = @transform_4, window_bounds = array<i64: 16, 1>}, {transform_indices = @transform_5, window_bounds = array<i64: 2, 16, 128>}]} {
    %c0 = arith.constant 0 : index
    %c0_0 = arith.constant 0 : index
    %c0_1 = arith.constant 0 : index
    %0 = vector.load %arg1[%c0, %c0_0, %c0_1] : memref<2x16x128xf32, #tpu.memory_space<vmem>>, vector<2x16x128xf32>
    %c0_2 = arith.constant 0 : index
    %c0_3 = arith.constant 0 : index
    %1 = vector.load %arg2[%c0_2, %c0_3] : memref<24x16xf32, #tpu.memory_space<vmem>>, vector<24x16xf32>
    %2 = vector.shape_cast %1 : vector<24x16xf32> to vector<1x24x16xf32>
    %3 = vector.shape_cast %2 : vector<1x24x16xf32> to vector<1x24x16xf32>
    %4 = vector.broadcast %3 : vector<1x24x16xf32> to vector<2x24x16xf32>
    %c0_4 = arith.constant 0 : index
    %c0_5 = arith.constant 0 : index
    %5 = vector.load %arg4[%c0_4, %c0_5] : memref<16x8xf32, #tpu.memory_space<vmem>>, vector<16x8xf32>
    %6 = vector.shape_cast %5 : vector<16x8xf32> to vector<1x16x8xf32>
    %7 = vector.shape_cast %6 : vector<1x16x8xf32> to vector<1x16x8xf32>
    %8 = vector.broadcast %7 : vector<1x16x8xf32> to vector<2x16x8xf32>
    %c0_6 = arith.constant 0 : index
    %c0_7 = arith.constant 0 : index
    %9 = vector.load %arg3[%c0_6, %c0_7] : memref<24x1xf32, #tpu.memory_space<vmem>>, vector<24x1xf32>
    %10 = vector.shape_cast %9 : vector<24x1xf32> to vector<1x24x1xf32>
    %c0_8 = arith.constant 0 : index
    %c0_9 = arith.constant 0 : index
    %11 = vector.load %arg5[%c0_8, %c0_9] : memref<16x1xf32, #tpu.memory_space<vmem>>, vector<16x1xf32>
    %12 = vector.shape_cast %11 : vector<16x1xf32> to vector<1x16x1xf32>
    "tpu.trace_start"() <{level = 10 : i32, message = "bkp,bpn->bkn"}> : () -> ()
    %cst = arith.constant dense<0.000000e+00> : vector<2x24x128xf32>
    %13 = tpu.matmul %4, %0, %cst {dimension_numbers = #tpu.dot_dimension_numbers<[2], [1], [1], [2], [0, 0, 0, 1, 1, 2], [0], [0]>} : vector<2x24x16xf32>, vector<2x16x128xf32>, vector<2x24x128xf32> -> vector<2x24x128xf32>
    "tpu.trace_stop"() : () -> ()
    %14 = vector.broadcast %10 : vector<1x24x1xf32> to vector<2x24x128xf32>
    %15 = arith.addf %13, %14 : vector<2x24x128xf32>
    %16 = vector.extract_strided_slice %15 {offsets = [0, 0, 0], sizes = [2, 8, 128], strides = [1, 1, 1]} : vector<2x24x128xf32> to vector<2x8x128xf32>
    %17 = vector.extract_strided_slice %15 {offsets = [0, 8, 0], sizes = [2, 8, 128], strides = [1, 1, 1]} : vector<2x24x128xf32> to vector<2x8x128xf32>
    %18 = vector.extract_strided_slice %15 {offsets = [0, 16, 0], sizes = [2, 8, 128], strides = [1, 1, 1]} : vector<2x24x128xf32> to vector<2x8x128xf32>
    "tpu.trace_start"() <{level = 10 : i32, message = "bcn,bdn->bcd"}> : () -> ()
    %cst_10 = arith.constant dense<0.000000e+00> : vector<2x8x8xf32>
    %19 = tpu.matmul %18, %17, %cst_10 {dimension_numbers = #tpu.dot_dimension_numbers<[2], [2], [1], [1], [0, 0, 0, 1, 1, 1], [0], [0]>} : vector<2x8x128xf32>, vector<2x8x128xf32>, vector<2x8x8xf32> -> vector<2x8x8xf32>
    "tpu.trace_stop"() : () -> ()
    %cst_11 = arith.constant dense<0xFF800000> : vector<2x8xf32>
    %20 = vector.multi_reduction <maximumf>, %19, %cst_11 [2] : vector<2x8x8xf32> to vector<2x8xf32>
    %21 = vector.shape_cast %20 : vector<2x8xf32> to vector<2x8x1xf32>
    %22 = vector.broadcast %21 : vector<2x8x1xf32> to vector<2x8x8xf32>
    %23 = arith.subf %19, %22 : vector<2x8x8xf32>
    %24 = math.exp %23 : vector<2x8x8xf32>
    %cst_12 = arith.constant dense<0.000000e+00> : vector<2x8xf32>
    %25 = vector.multi_reduction <add>, %24, %cst_12 [2] : vector<2x8x8xf32> to vector<2x8xf32>
    %26 = vector.shape_cast %25 : vector<2x8xf32> to vector<2x8x1xf32>
    %27 = vector.broadcast %26 : vector<2x8x1xf32> to vector<2x8x8xf32>
    %28 = arith.divf %24, %27 : vector<2x8x8xf32>
    "tpu.trace_start"() <{level = 10 : i32, message = "bcd,bcn->bdn"}> : () -> ()
    %cst_13 = arith.constant dense<0.000000e+00> : vector<2x8x128xf32>
    %29 = tpu.matmul %28, %16, %cst_13 {dimension_numbers = #tpu.dot_dimension_numbers<[1], [1], [2], [2], [0, 0, 0, 2, 1, 2], [0], [0]>} : vector<2x8x8xf32>, vector<2x8x128xf32>, vector<2x8x128xf32> -> vector<2x8x128xf32>
    "tpu.trace_stop"() : () -> ()
    "tpu.trace_start"() <{level = 10 : i32, message = "bpc,bcn->bpn"}> : () -> ()
    %cst_14 = arith.constant dense<0.000000e+00> : vector<2x16x128xf32>
    %30 = tpu.matmul %8, %29, %cst_14 {dimension_numbers = #tpu.dot_dimension_numbers<[2], [1], [1], [2], [0, 0, 0, 1, 1, 2], [0], [0]>} : vector<2x16x8xf32>, vector<2x8x128xf32>, vector<2x16x128xf32> -> vector<2x16x128xf32>
    "tpu.trace_stop"() : () -> ()
    %31 = vector.broadcast %12 : vector<1x16x1xf32> to vector<2x16x128xf32>
    %32 = arith.addf %30, %31 : vector<2x16x128xf32>
    %33 = arith.addf %32, %0 : vector<2x16x128xf32>
    %cst_15 = arith.constant 0.000000e+00 : f32
    %34 = vector.broadcast %cst_15 : f32 to vector<2x16x128xf32>
    %35 = arith.maximumf %33, %34 : vector<2x16x128xf32>
    %c0_16 = arith.constant 0 : index
    %c0_17 = arith.constant 0 : index
    %c0_18 = arith.constant 0 : index
    %36 = vector.load %arg6[%c0_16, %c0_17, %c0_18] : memref<2x16x128xf32, #tpu.memory_space<vmem>>, vector<2x16x128xf32>
    tpu.vector_store %arg6[%c0_16, %c0_17, %c0_18], %35 {strides = array<i32>} : memref<2x16x128xf32, #tpu.memory_space<vmem>>, vector<2x16x128xf32>,
    return
  }
  func.func @transform_0(%arg0: i32) -> (i32, i32, i32) {
    %c0_i32 = arith.constant 0 : i32
    %c0_i32_0 = arith.constant 0 : i32
    %c0_i32_1 = arith.constant 0 : i32
    return %arg0, %c0_i32, %c0_i32_0 : i32, i32, i32
  }
  func.func @transform_1(%arg0: i32) -> (i32, i32) {
    %c0_i32 = arith.constant 0 : i32
    %c0_i32_0 = arith.constant 0 : i32
    %c0_i32_1 = arith.constant 0 : i32
    return %c0_i32, %c0_i32_0 : i32, i32
  }
  func.func @transform_2(%arg0: i32) -> (i32, i32) {
    %c0_i32 = arith.constant 0 : i32
    %c0_i32_0 = arith.constant 0 : i32
    %c0_i32_1 = arith.constant 0 : i32
    return %c0_i32, %c0_i32_0 : i32, i32
  }
  func.func @transform_3(%arg0: i32) -> (i32, i32) {
    %c0_i32 = arith.constant 0 : i32
    %c0_i32_0 = arith.constant 0 : i32
    %c0_i32_1 = arith.constant 0 : i32
    return %c0_i32, %c0_i32_0 : i32, i32
  }
  func.func @transform_4(%arg0: i32) -> (i32, i32) {
    %c0_i32 = arith.constant 0 : i32
    %c0_i32_0 = arith.constant 0 : i32
    %c0_i32_1 = arith.constant 0 : i32
    return %c0_i32, %c0_i32_0 : i32, i32
  }
  func.func @transform_5(%arg0: i32) -> (i32, i32, i32) {
    %c0_i32 = arith.constant 0 : i32
    %c0_i32_0 = arith.constant 0 : i32
    %c0_i32_1 = arith.constant 0 : i32
    return %arg0, %c0_i32, %c0_i32_0 : i32, i32, i32
  }
}

</mosaic_0001>

<bundles_post_ra>
// kernel: tpu_custom_call.1
= control target key start
LH: loop header
LB: loop body
LE: loop exit
PB: predicated region body
PF: predicated region fallthrough
CT: control target
= control target key end

     0   :  { %10 = vsyncpa [#allocation3], 0  ;;  %s1509_s0 = inlined_call_operand.vmem [shape: f32[4,16,128], index: 0, kind: input, shape index: {}]   ;;  %s1510_s1 = inlined_call_operand.vmem [shape: f32[24,16], index: 1, kind: input, shape index: {}]   ;;  %s1511_s2 = inlined_call_operand.vmem [shape: f32[24,1], index: 2, kind: input, shape index: {}]   ;;  %s1512_s3 = inlined_call_operand.vmem [shape: f32[16,8], index: 3, kind: input, shape index: {}]   ;;  %s1513_s4 = inlined_call_operand.vmem [shape: f32[16,1], index: 4, kind: input, shape index: {}]   ;;  %s1514_s5 = inlined_call_operand.hbm [shape: f32[4,16,128], index: 5, kind: output, shape index: {}]  }
   0x1   :  { %12 = vsyncpa [#allocation3 + $0x1], 0  ;;  %s1327_s18 = smov 0   ;;  %s1329_s19 = smov 0  }
   0x2   :  { %s1331_s20 = smov 0   ;;  %s1333_s21 = smov 0  }
   0x3 LB: > { %s1348_s22 = sadd.s32 4294967295, %s1288_s21   ;;  %s1056_s23 = sadd.s32 4294967294, %s1288_s21   ;;  %s1288_s21 = sphi %s1333_s21, %s1520_s21   ;;  %s1284_s20 = sphi %s1331_s20, %s1519_s20   ;;  %s1280_s19 = sphi %s1329_s19, %s1518_s19   ;;  %s1276_s18 = sphi %s1327_s18, %s1517_s18  }
   0x4   : > { %s1352_s24 = sadd.s32 1, %s1288_s21   ;;  %s135_s25 = sadd.s32 1, %s1284_s20 }
   0x5   : > { %s132_s26 = ssub.s32 %s1288_s21, %s1352_s24  ;;  %p145_p0 = scmp.ne.s32.totalorder %s1284_s20, %s1280_s19 }
   0x6   : > { %p133_p1 = scmp.eq.s32.totalorder %s132_s26, 0  ;;  %p146_p2 = scmp.eq.s32.totalorder %s1348_s22, 1 }
   0x7   : > { %p151_p3 = scmp.ne.s32.totalorder %s1280_s19, %s1276_s18  ;;  %p152_p4 = scmp.eq.s32.totalorder %s1056_s23, 1 }
   0x8   : > { %s1363_s27 = scalar_select %p133_p1, %s1284_s20, %s135_s25  }
   0x9   : > { %p1365_p5 = por %p146_p2, %p145_p0  ;;  %p1369_p6 = por %p152_p4, %p151_p3 }
   0xa   : > { %p1059_p7 = scmp.ge.s32.totalorder %s1288_s21, 1  ;;  %p192_p8 = scmp.lt.s32.totalorder %s1288_s21, 3 }
   0xc   : > { %p193_p9 = pnand %p1059_p7, %p192_p8 }
   0xd   : > { %s1061_s30 = sshll.u32 (!%p193_p9), %s1348_s22, 1  ;;  %v1290_v0 = vmov (!%p193_p9), 0.0|0.0   ;;  %v239_v1 = vld [vmem:[%s1511_s2 + $0x8] sm:$0xff] (!%p193_p9)  ;;  %vm1291_vm0 = vmmov (!%p193_p9), 0   ;;  %v1292_v2 = vmov (!%p193_p9), 0.0   ;;  %v1293_v3 = vmov (!%p193_p9), 0  }
   0xe   : > { %196 = sbr.rel (%p193_p9) target bundleno = 1359 (0x54f), region = 40  ;;  %1165 = vmatprep.subr.bf16.mxu0 (!%p193_p9), %v1290_v0  ;;  %1168 = vmatprep.subr.bf16.mxu1 (!%p193_p9), %v1290_v0  ;;  %p222_p10 = scmp.lt.s32.totalorder (!%p193_p9), %s1061_s30, 3  ;;  %v240_v4 = vld [vmem:[%s1511_s2 + $0x10] sm:$0xff] (!%p193_p9)  ;;  %v233_v11 = vld [vmem:[%s1510_s1] sm:$0xff] (!%p193_p9)  ;;  %vm258_vm1 = vcmask (!%p193_p9), 130048   ;;  %v234_v12 = vld [vmem:[%s1510_s1 + $0x8] sm:$0xff] (!%p193_p9) }
   0xf   : > { %1113 = vmatprep.mubr.msk.f32.mxu0 (!%p193_p9), %vm1291_vm0, %v1292_v2  ;;  %1126 = vmatprep.mubr.msk.f32.mxu1 (!%p193_p9), %vm1291_vm0, %v1292_v2  ;;  %v235_v13 = vld [vmem:[%s1510_s1 + $0x10] sm:$0xff] (!%p193_p9)  ;;  %vm568_vm2 = vcmask (!%p193_p9), 64512   ;;  %v238_v48 = vld [vmem:[%s1511_s2] sm:$0xff] (!%p193_p9)  ;;  %v242_v59 = vld [vmem:[%s1513_s4 + $0x8] sm:$0xff] (!%p193_p9)  ;;  %s218_s14 = sand.u32 (!%p193_p9), 1, %s1280_s19   ;;  %s1084_s23 = sshll.u32 (!%p193_p9), %s1348_s22, 9 }
  0x10   : > { %1216 = vset.pattern.permute.xlu0 (!%p193_p9), %v1293_v3  ;;  %1217 = vset.pattern.permute.xlu1 (!%p193_p9), %v1293_v3  ;;  %v241_v58 = vld [vmem:[%s1513_s4] sm:$0xff] (!%p193_p9)  ;;  %v237_v0 = vld [vmem:[%s1512_s3 + $0x8] sm:$0xff] (!%p193_p9)  ;;  %s1060_s15 = sshll.u32 (!%p193_p9), %s218_s14, 5  ;;  %s1468_s6 = scalar_lea.sflag (!%p193_p9), [#allocation3], %s218_s14 }
  0x11   : > { %250 = vperm.xlu0 (!%p193_p9), %1216, %v239_v1   ;;  %v236_v62 = vld [vmem:[%s1512_s3] sm:$0xff] (!%p193_p9)  ;;  %s220_s16 = scalar_lea.vmem (!%p193_p9), [#allocation2], %s1060_s15  ;;  %s1294_s7 = smov (!%p193_p9), [#allocation2]  }
  0x12   : > { %s994_s17 = sshll.u32 (!%p193_p9), %s220_s16, 4  ;;  %s1461_s17 = int_to_ptr.vmem [resolvable:$true] %s994_s17 }
  0x13   : > { %s1226_s22 = scalar_lea.vmem (!%p193_p9), %s1461_s17, 512 }
  0x14   : > { %p1227_p11 = scmp.ne.s32.totalorder (!%p193_p9), %s1461_s17, %s1226_s22 }
  0x15   : > { %s1522_s30 = smov (!%p222_p10, %s1061_s30), 3  ;;  %255 = vperm.xlu0 %1216, %v240_v4  }
  0x16   : > { %s1082_s8 = sshll.u32 %s1522_s30, 4  ;;  %s1466_s30 = scalar_lea.hbm %s1514_s5, %s1084_s23 }
  0x17   : > { %s226_s13 = scalar_lea.vmem %s1509_s0, %s1082_s8  ;;  %p1228_p12 = pnand %p1227_p11, %p1365_p5 }
  0x18   : > { %v1389_v5 = vld [vmem:[%s226_s13] sm:$0xff]  ;;  %v1391_v6 = vld [vmem:[%s226_s13 + $0x8] sm:$0xff]  ;;  %v1393_v7 = vld [vmem:[%s226_s13 + $0x10] sm:$0xff]  ;;  %s1230_s8 = sshll.u32 %s1294_s7, 4  ;;  %s1231_s8 = int_to_ptr.vmem [resolvable:$false] %s1230_s8 }
  0x19   : > { %v1166_v8 = vpack.c.bf16 %v1391_v6, %v1389_v5  ;;  %v1397_v9 = vld [vmem:[%s226_s13 + $0x18] sm:$0xff]  ;;  %p1229_p13 = pneg %p1228_p12  ;;  %s1232_s9 = scalar_lea.vmem %s1231_s8, 1024 }
  0x1a   : > { %v1169_v10 = vpack.c.bf16 %v1397_v9, %v1393_v7  ;;  %p1233_p0 = scmp.lt.s32.totalorder %s1461_s17, %s1231_s8  ;;  %p1234_p1 = scmp.lt.s32.totalorder %s1232_s9, %s1226_s22 }
  0x1b   : > { %1167 = vmatpush3.bf16.msra.mxu0 %v1166_v8 }
  0x1c   : > { %1170 = vmatpush3.bf16.msra.mxu1 %v1169_v10  ;;  %1135 = vmatprep.subr.mxu0 %v1292_v2  ;;  %p1235_p2 = por %p1234_p1, %p1233_p0 }
  0x1d   : > { %1140 = vmatprep.subr.mxu1 %v1292_v2 }
  0x1e   : > { %1114 = vmatmul.mubr.msk.f32.vlgmr.msra.gmra.mrb[0].mxu0 %vm258_vm1, %v233_v11  ;;  %p1236_p3 = pnand %p1235_p2, %p1229_p13 }
  0x1f   : > { %1127 = vmatmul.mubr.msk.f32.vlgmr.msra.gmra.mrb[0].mxu1 %vm258_vm1, %v233_v11  ;;  %1116 = vmatprep.mubr.msk.f32.mxu0 %vm1291_vm0, %v1292_v2 }
  0x20   : > { %1129 = vmatprep.mubr.msk.f32.mxu1 %vm1291_vm0, %v1292_v2 }
  0x22   : > { %1117 = vmatmul.mubr.msk.f32.gmra.mrb[2].mxu0 %vm258_vm1, %v234_v12 }
  0x23   : > { %1130 = vmatmul.mubr.msk.f32.gmra.mrb[2].mxu1 %vm258_vm1, %v234_v12  ;;  %1119 = vmatprep.mubr.msk.f32.mxu0 %vm1291_vm0, %v1292_v2 }
  0x24   : > { %1132 = vmatprep.mubr.msk.f32.mxu1 %vm1291_vm0, %v1292_v2 }
  0x26   : > { %1120 = vmatmul.mubr.msk.f32.gmra.mrb[4].mxu0 %vm258_vm1, %v235_v13 }
  0x27   : > { %1133 = vmatmul.mubr.msk.f32.gmra.mrb[4].mxu1 %vm258_vm1, %v235_v13  ;;  %1137 = vmatprep.mubr.msk.f32.mxu0 %vm1291_vm0, %v1292_v2 }
  0x28   : > { %1142 = vmatprep.mubr.msk.f32.mxu1 %vm1291_vm0, %v1292_v2 }
  0x90   : > { %v251_v17 = vpop.permute.xlu0 %250 }
  0x94   : > { %v256_v25 = vpop.permute.xlu0 %255 }
  0xf1   : > { %v334_v14 = vpop.f32.mrb[0].mxu0 }
  0xf2   : > { %v1115_v15 = vpop.f32.mrb[1].mxu0  ;;  %v414_v16 = vpop.f32.mrb[0].mxu1 }
  0xf3   : > { %v1128_v18 = vpop.f32.mrb[1].mxu1 }
  0xf5   : > { %v339_v19 = vpop.f32.mrb[2].mxu0 }
  0xf6   : > { %v340_v20 = vadd.f32 %v339_v19, %v251_v17  ;;  %v419_v21 = vpop.f32.mrb[2].mxu1  ;;  %v1118_v22 = vpop.f32.mrb[3].mxu0 }
  0xf7   : > { %v420_v23 = vadd.f32 %v419_v21, %v251_v17  ;;  %v1131_v24 = vpop.f32.mrb[3].mxu1 }
  0xf8   : > { %1136 = vmatpush3.xpose.msra.mxu0 %v340_v20 }
  0xf9   : > { %1141 = vmatpush3.xpose.msra.mxu1 %v420_v23  ;;  %v344_v26 = vpop.f32.mrb[4].mxu0  ;;  %1145 = vmatprep.subr.mxu0 %v1292_v2 }
  0xfa   : > { %v345_v27 = vadd.f32 %v344_v26, %v256_v25  ;;  %v424_v28 = vpop.f32.mrb[4].mxu1  ;;  %v1121_v29 = vpop.f32.mrb[5].mxu0  ;;  %1150 = vmatprep.subr.mxu1 %v1292_v2 }
  0xfb   : > { %v425_v30 = vadd.f32 %v424_v28, %v256_v25  ;;  %v1134_v31 = vpop.f32.mrb[5].mxu1 }
  0xfc   : > { %1138 = vmatmul.mubr.f32.vlgmr.msra.gmra.mrb[6].mxu0 %v345_v27 }
  0xfd   : > { %1143 = vmatmul.mubr.f32.vlgmr.msra.gmra.mrb[6].mxu1 %v425_v30  ;;  %1147 = vmatprep.mubr.msk.f32.mxu0 %vm1291_vm0, %v1292_v2 }
  0xfe   : > { %1152 = vmatprep.mubr.msk.f32.mxu1 %vm1291_vm0, %v1292_v2 }
 0x1cf   : > { %v494_v32 = vpop.f32.mrb[6].mxu0 }
 0x1d0   : > { %v564_v33 = vpop.f32.mrb[6].mxu1  ;;  %v1139_v34 = vpop.f32.mrb[7].mxu0  ;;  %v569_v35 = vsel %vm568_vm2, %v494_v32, -inf }
 0x1d1   : > { %v1144_v36 = vpop.f32.mrb[7].mxu1  ;;  %570 = vmax.xlane.f32.xlu1 %v569_v35  ;;  %v572_v37 = vsel %vm568_vm2, %v564_v33, -inf }
 0x1d5   : > { %573 = vmax.xlane.f32.xlu1 %v572_v37 }
 0x25e   : > { %v571_v38 = vpop.xlane.xlu1 %570 }
 0x25f   : > { %v575_v39 = vsub.f32 %v494_v32, %v571_v38 }
 0x261   : > { %v577_v40 = vmul.f32 1.442695, %v575_v39 }
 0x262   : > { %v574_v41 = vpop.xlane.xlu1 %573 }
 0x263   : > { %1218 = vpow2.f32 %v577_v40  ;;  %v576_v42 = vsub.f32 %v564_v33, %v574_v41 }
 0x265   : > { %v579_v43 = vmul.f32 1.442695, %v576_v42 }
 0x267   : > { %1220 = vpow2.f32 %v579_v43 }
 0x26d   : > { %v1219_v44 = vpop.eup %1218 }
 0x26e   : > { %v581_v45 = vsel %vm568_vm2, %v1219_v44, 0.0 }
 0x26f   : > { %582 = vadd.xlane.f32.xlu0 %v581_v45 }
 0x271   : > { %v1221_v46 = vpop.eup %1220 }
 0x272   : > { %v584_v47 = vsel %vm568_vm2, %v1221_v46, 0.0 }
 0x273   : > { %585 = vadd.xlane.f32.xlu1 %v584_v47 }
 0x284   : > { %245 = vperm.xlu1 %1217, %v238_v48  }
 0x2fc   : > { %v583_v49 = vpop.xlane.xlu0 %582 }
 0x2fd   : > { %1222 = vrcp.f32 %v583_v49 }
 0x300   : > { %v586_v50 = vpop.xlane.xlu1 %585 }
 0x301   : > { %1224 = vrcp.f32 %v586_v50 }
 0x304   : > { %v246_v51 = vpop.permute.xlu1 %245 }
 0x305   : > { %v335_v52 = vadd.f32 %v334_v14, %v246_v51  ;;  %v415_v53 = vadd.f32 %v414_v16, %v246_v51 }
 0x307   : > { %v1223_v54 = vpop.eup %1222  ;;  %1146 = vmatpush3.msra.mxu0 %v335_v52  ;;  %1151 = vmatpush3.msra.mxu1 %v415_v53 }
 0x308   : > { %v588_v55 = vmul.f32 %v1223_v54, %v1219_v44 }
 0x30a   : > { %591 = vxpose.xlu1.b32.start.end [1/1] (short) (narrow) %v588_v55, 8 }
 0x30b   : > { %v1225_v56 = vpop.eup %1224 }
 0x30c   : > { %v590_v57 = vmul.f32 %v1225_v56, %v1221_v46 }
 0x30e   : > { %696 = vxpose.xlu0.b32.start.end [1/1] (short) (narrow) %v590_v57, 8 }
 0x328   : > { %803 = vperm.xlu1 %1217, %v241_v58  }
 0x337   : > { %808 = vperm.xlu0 %1216, %v242_v59  }
 0x38a   : > { %v607_v60 = vpop.trf.xlu1 }
 0x38b   : > { %1148 = vmatmul.mubr.msk.f32.vlgmr.msra.gmra.mrb[8].mxu0 %vm568_vm2, %v607_v60 }
 0x38c   : > { %1157 = vmatprep.mubr.msk.f32.mxu0 %vm568_vm2, %v236_v62 }
 0x38e   : > { %v712_v61 = vpop.trf.xlu0 }
 0x38f   : > { %1153 = vmatmul.mubr.msk.f32.vlgmr.msra.gmra.mrb[8].mxu1 %vm568_vm2, %v712_v61 }
 0x390   : > { %1162 = vmatprep.mubr.msk.f32.mxu1 %vm568_vm2, %v236_v62 }
 0x3a7   : > { %v804_v10 = vpop.permute.xlu1 %803 }
 0x3b6   : > { %v809_v4 = vpop.permute.xlu0 %808 }
 0x45e   : > { %v692_v63 = vpop.f32.mrb[8].mxu0 }
 0x45f   : > { %1155 = vmatprep.subr.mxu0 %v692_v63  ;;  %v1149_v1 = vpop.f32.mrb[9].mxu0 }
 0x460   : > { %1156 = vmatpush3.msra.mxu0 %v692_v63 }
 0x461   : > { %1158 = vmatmul.mubr.msk.f32.vlgmr.msra.gmra.mrb[10].mxu0 %vm568_vm2, %v237_v0 }
 0x462   : > { %v797_v2 = vpop.f32.mrb[8].mxu1 }
 0x463   : > { %1160 = vmatprep.subr.mxu1 %v797_v2  ;;  %v1154_v3 = vpop.f32.mrb[9].mxu1 }
 0x464   : > { %1161 = vmatpush3.msra.mxu1 %v797_v2 }
 0x465   : > { %1163 = vmatmul.mubr.msk.f32.vlgmr.msra.gmra.mrb[10].mxu1 %vm568_vm2, %v237_v0 }
 0x534   : > { %v1159_v8 = vpop.f32.mrb[10].mxu0 }
 0x535   : > { %v889_v11 = vadd.f32 %v1159_v8, %v809_v4  ;;  %v883_v12 = vpop.f32.mrb[11].mxu0 }
 0x536   : > { %v884_v13 = vadd.f32 %v883_v12, %v804_v10 }
 0x537   : > { %v968_v14 = vadd.f32 %v889_v11, %v1391_v6 }
 0x538   : > { %v967_v15 = vadd.f32 %v884_v13, %v1389_v5  ;;  %v1164_v16 = vpop.f32.mrb[10].mxu1 }
 0x539   : > { %v972_v17 = vmax.f32 %v968_v14, 0.0  ;;  %v964_v18 = vadd.f32 %v1164_v16, %v809_v4  ;;  %v958_v19 = vpop.f32.mrb[11].mxu1 }
 0x53a   : > { %v971_v20 = vmax.f32 %v967_v15, 0.0  ;;  %v959_v21 = vadd.f32 %v958_v19, %v804_v10 }
 0x53b   : > { %976 = vst [vmem:[%s220_s16 + $0x8] sm:$0xff] %v972_v17  ;;  %v970_v22 = vadd.f32 %v964_v18, %v1397_v9 }
 0x53c   : > { %975 = vst [vmem:[%s220_s16] sm:$0xff] %v971_v20  ;;  %v969_v23 = vadd.f32 %v959_v21, %v1393_v7 }
 0x53d   : > { %v974_v5 = vmax.f32 %v970_v22, 0.0 }
 0x53e   : > { %v973_v6 = vmax.f32 %v969_v23, 0.0 }
 0x53f   : > { %978 = vst [vmem:[%s220_s16 + $0x18] sm:$0xff] %v974_v5 }
 0x540   : > { %977 = vst [vmem:[%s220_s16 + $0x10] sm:$0xff] %v973_v6 }
 0x541   : > { %1239 = shalt.err (!%p1236_p3)
}
 0x542   : > { %s1240_s10 = scalar_lea.hbm %s1466_s30, 512  ;;  %s1244_s13 = scalar_lea.hbm %s1514_s5, 1024 }
 0x543   : > { %p1241_p4 = scmp.ne.s32.totalorder %s1466_s30, %s1240_s10  ;;  %p1245_p9 = scmp.lt.u32.totalorder %s1466_s30, %s1514_s5 }
 0x544   : > { %p1246_p10 = scmp.lt.u32.totalorder %s1244_s13, %s1240_s10  ;;  %p1248_p12 = scmp.lt.u32.totalorder %s1240_s10, %s1466_s30 }
 0x545   : > { %p1242_p7 = pnand %p1241_p4, %p1365_p5 }
 0x546   : > { %p1247_p11 = por %p1246_p10, %p1245_p9 }
 0x547   : > { %p1243_p8 = pneg %p1242_p7 }
 0x548   : > { %p1249_p13 = por %p1248_p12, %p1247_p11 }
 0x54a   : > { %p1250_p0 = pnand %p1249_p13, %p1243_p8 }
 0x54c   : > { %1253 = shalt.err (!%p1250_p0)
}
 0x54d   : > { %s1295_s16 = smov 128   ;;  %s1296_s23 = smov 8  }
 0x54e   : > { %1171 = dma.vmem_to_hbm [thread:$0]  (%p1365_p5), %s1461_s17, 512, %s1466_s30, %s1468_s6, %s1295_s16, %s1295_s16, %s1296_s23  }
 0x54f PF: > { %p1177_p1 = scmp.ge.s32.totalorder %s1288_s21, 2  ;;  %s1009_s25 = sand.u32 1, %s1276_s18  }
 0x550   : > { %s1010_s26 = scalar_lea.sflag [#allocation3], %s1009_s25 }
 0x551   : > { %p1174_p2 = pnand %p1177_p1, %p1369_p6 }
 0x553   : > { %1271 = dma.done.wait (!%p1174_p2), %s1010_s26, 512  }
 0x554   : > { %1273 = vsyncadd (!%p1174_p2), %s1010_s26, 4294966784  ;;  %p15_p3 = scmp.ge.s32.totalorder %s1352_s24, 4   ;;  %s1517_s18 = smov %s1280_s19 }
 0x555   : > { %s1518_s19 = smov %s1284_s20  ;;  %s1519_s20 = smov %s1363_s27 }
 0x556   : > { %s1520_s21 = smov %s1352_s24  ;;  %17 = sbr.rel (!%p15_p3) target bundleno = 3 (0x3), region = 75 }
 0x55d   :  { %1015 = vsyncpa [#allocation3], 1 }
 0x55e   :  { %1017 = vsyncpa [#allocation3 + $0x1], 1 }

</bundles_post_ra>
